<compile_context>
chip_gen: v7x
topology: tpu7x:2x2x1
jax: 0.10.0
libtpu: 0.0.40
codegen_flags: <defaults>
</compile_context>

<pallas_src>
import numpy as np
import jax
import jax.numpy as jnp
from jax.experimental import pallas as pl
from jax.experimental.pallas import tpu as pltpu


def _round_up(x, m):
    return (x + m - 1) // m * m


def _leaky_relu(x, slope=0.2):
    # One VALU max instead of compare+mul+select; identical for slope in (0,1).
    return jnp.maximum(x, slope * x)


def discriminator_kernel(x_ref, w1_ref, b1_ref, w2_ref, b2_ref, w3t_ref, b3_ref,
                         o_ref):
    # One batch tile per grid step; weights are VMEM-resident (constant block
    # index), x/out tiles stream and are double-buffered by the Pallas pipeline.
    x = x_ref[...]                                                # (TB, F) bf16

    # Layer 1: bf16 x bf16 -> f32 on the MXU.
    h1 = jnp.dot(x, w1_ref[...], preferred_element_type=jnp.float32) + b1_ref[...]
    h1 = _leaky_relu(h1)

    # Layer 2.
    h2 = jnp.dot(h1.astype(jnp.bfloat16), w2_ref[...],
                 preferred_element_type=jnp.float32) + b2_ref[...]
    h2 = _leaky_relu(h2)

    # Layer 3 (256 -> 1): VPU multiply + cross-lane reduction instead of an
    # MXU matmul with a single output lane (1/256 lane utilization).
    h3 = jnp.sum(h2 * w3t_ref[...], axis=-1, keepdims=True) + b3_ref[...]

    # Sigmoid: EUP exp + EUP approximate reciprocal (free bundle slots).
    o_ref[...] = pl.reciprocal(1.0 + jnp.exp(-h3), approx=True)


def discriminator_forward(img, params):
    """img: (N, C, H, W) float32. Returns validity (N, 1) float32."""
    n = img.shape[0]
    x = img.reshape(n, -1).astype(jnp.float32)        # NCHW -> (N, F)
    f = x.shape[1]
    w1, b1, w2, b2, w3, b3 = params

    # bf16 weight / activation streaming (f32 accumulation keeps accuracy).
    x_bf = x.astype(jnp.bfloat16)
    w1_bf = w1.astype(jnp.bfloat16)
    w2_bf = w2.astype(jnp.bfloat16)
    w3t_bf = jnp.transpose(w3).astype(jnp.bfloat16)   # (1, 256) row for reduction
    b3_2d = b3.reshape(1, 1)

    # Batch tiling: sublane-aligned tile (multiple of 8), capped at 256 rows.
    tb = min(256, _round_up(n, 8))
    n_pad = _round_up(n, tb)
    if n_pad != n:
        x_bf = jnp.pad(x_bf, ((0, n_pad - n), (0, 0)))
    nb = n_pad // tb

    # NOTE: if img_area grows very large, add a second ('arbitrary') grid axis
    # tiling F for layer 1 with a VMEM f32 accumulator so the (TB, F) / (F, 512)
    # blocks stay flat in VMEM (64 MiB total on v7x).

    # VMEM footprint: resident bf16 weights + double-buffered x/out tiles +
    # f32 activations. Only override the compiler default when we need more.
    weight_bytes = int(w1_bf.size + w2_bf.size + w3t_bf.size) * 2 \
        + int(b1.size + b2.size + b3_2d.size) * 4
    act_bytes = tb * (2 * f * 2          # x tile, double-buffered, bf16
                      + 512 * 4 + 256 * 4  # h1 / h2 f32
                      + 2 * 1 * 4)         # out tile, double-buffered
    vmem_needed = 2 * (weight_bytes + act_bytes) + (2 << 20)
    vmem_limit = vmem_needed if vmem_needed > (16 << 20) else None

    flops = 2 * n_pad * (f * 512 + 512 * 256 + 256)
    bytes_accessed = int(x_bf.size) * 2 + weight_bytes + n_pad * 4
    cost = pl.CostEstimate(flops=flops, transcendentals=2 * n_pad,
                           bytes_accessed=bytes_accessed)

    # Full-array blocks (satisfy the (8,128) rule via the full-extent exemption).
    full = lambda a: pl.BlockSpec(a.shape, lambda i, _nd=None, _a=a: (0,) * a.ndim)

    out = pl.pallas_call(
        discriminator_kernel,
        out_shape=jax.ShapeDtypeStruct((n_pad, 1), jnp.float32),
        grid_spec=pltpu.PrefetchScalarGridSpec(
            num_scalar_prefetch=0,
            grid=(nb,),
            in_specs=[
                pl.BlockSpec((tb, f), lambda i: (i, 0)),   # x: streamed per tile
                full(w1_bf), full(b1),                     # weights/biases:
                full(w2_bf), full(b2),                     #   VMEM-resident
                full(w3t_bf), full(b3_2d),
            ],
            out_specs=pl.BlockSpec((tb, 1), lambda i: (i, 0)),
        ),
        compiler_params=pltpu.CompilerParams(
            dimension_semantics=("parallel",),   # megacore sharding on v7x
            vmem_limit_bytes=vmem_limit),
        cost_estimate=cost,
    )(x_bf, w1_bf, b1, w2_bf, b2, w3t_bf, b3_2d)

    return out[:n]


def init_params(key, img_area):
    """Deterministic init mimicking torch.nn.Linear default (U[-1/sqrt(fan_in), +])."""
    dims = [(img_area, 512), (512, 256), (256, 1)]
    params = []
    for fan_in, fan_out in dims:
        kw, kb, key = jax.random.split(key, 3)
        bound = 1.0 / np.sqrt(fan_in)
        w = jax.random.uniform(kw, (fan_in, fan_out), jnp.float32,
                               minval=-bound, maxval=bound)
        b = jax.random.uniform(kb, (1, fan_out), jnp.float32,
                               minval=-bound, maxval=bound)
        params.extend([w, b])
    return tuple(params)


def reference_forward(img, params):
    """Plain-JAX float32 reference for correctness checking."""
    n = img.shape[0]
    x = img.reshape(n, -1).astype(jnp.float32)
    w1, b1, w2, b2, w3, b3 = params
    h = x @ w1 + b1
    h = jnp.maximum(h, 0.2 * h)
    h = h @ w2 + b2
    h = jnp.maximum(h, 0.2 * h)
    return jax.nn.sigmoid(h @ w3 + b3)


if __name__ == "__main__":
    # Small shapes consistent with the module: batch=2, channels=1, img_size=16
    # => img_area = 1 * 16 * 16 = 256.
    batch, channels, img_size = 2, 1, 16
    img_area = channels * img_size * img_size

    key = jax.random.PRNGKey(0)
    k_img, k_param = jax.random.split(key)
    img = jax.random.normal(k_img, (batch, channels, img_size, img_size),
                            dtype=jnp.float32)
    params = init_params(k_param, img_area)

    out = discriminator_forward(img, params)
    out = jax.block_until_ready(out)

    ref = reference_forward(img, params)
    assert out.shape == (batch, 1), out.shape
    # bf16 weight/activation streaming -> compare to f32 reference loosely.
    np.testing.assert_allclose(np.asarray(out), np.asarray(ref),
                               rtol=2e-2, atol=2e-2)
    print("KERNEL_OK")
</pallas_src>

<mosaic_0001>
module attributes {stable_mosaic.version = 11 : i64} {
  func.func @discriminator_kernel(%arg0: i32, %arg1: memref<8x256xbf16, #tpu.memory_space<vmem>>, %arg2: memref<256x512xbf16, #tpu.memory_space<vmem>>, %arg3: memref<1x512xf32, #tpu.memory_space<vmem>>, %arg4: memref<512x256xbf16, #tpu.memory_space<vmem>>, %arg5: memref<1x256xf32, #tpu.memory_space<vmem>>, %arg6: memref<1x256xbf16, #tpu.memory_space<vmem>>, %arg7: memref<1x1xf32, #tpu.memory_space<vmem>>, %arg8: memref<8x1xf32, #tpu.memory_space<vmem>>) attributes {dimension_semantics = [#tpu.dimension_semantics<parallel>], iteration_bounds = array<i64: 1>, scalar_prefetch = 0 : i64, scratch_operands = 0 : i64, tpu.core_type = #tpu.core_type<tc>, window_params = [{transform_indices = @transform_0, window_bounds = array<i64: 8, 256>}, {pipeline_mode = #tpu.pipeline_mode<synchronous>, transform_indices = @transform_1, window_bounds = array<i64: 256, 512>}, {pipeline_mode = #tpu.pipeline_mode<synchronous>, transform_indices = @transform_2, window_bounds = array<i64: 1, 512>}, {pipeline_mode = #tpu.pipeline_mode<synchronous>, transform_indices = @transform_3, window_bounds = array<i64: 512, 256>}, {pipeline_mode = #tpu.pipeline_mode<synchronous>, transform_indices = @transform_4, window_bounds = array<i64: 1, 256>}, {pipeline_mode = #tpu.pipeline_mode<synchronous>, transform_indices = @transform_5, window_bounds = array<i64: 1, 256>}, {pipeline_mode = #tpu.pipeline_mode<synchronous>, transform_indices = @transform_6, window_bounds = array<i64: 1, 1>}, {transform_indices = @transform_7, window_bounds = array<i64: 8, 1>}]} {
    %c0 = arith.constant 0 : index
    %c0_0 = arith.constant 0 : index
    %0 = vector.load %arg1[%c0, %c0_0] : memref<8x256xbf16, #tpu.memory_space<vmem>>, vector<8x256xbf16>
    %c0_1 = arith.constant 0 : index
    %c0_2 = arith.constant 0 : index
    %1 = vector.load %arg2[%c0_1, %c0_2] : memref<256x512xbf16, #tpu.memory_space<vmem>>, vector<256x512xbf16>
    %cst = arith.constant dense<0.000000e+00> : vector<8x512xf32>
    %2 = tpu.matmul %0, %1, %cst {dimension_numbers = #tpu.dot_dimension_numbers<[1], [0], [0], [1], [0, 0, 1, 1], [], []>} : vector<8x256xbf16>, vector<256x512xbf16>, vector<8x512xf32> -> vector<8x512xf32>
    %c0_3 = arith.constant 0 : index
    %c0_4 = arith.constant 0 : index
    %3 = vector.load %arg3[%c0_3, %c0_4] : memref<1x512xf32, #tpu.memory_space<vmem>>, vector<1x512xf32>
    %4 = vector.broadcast %3 : vector<1x512xf32> to vector<8x512xf32>
    %5 = arith.addf %2, %4 : vector<8x512xf32>
    %cst_5 = arith.constant 2.000000e-01 : f32
    %6 = vector.broadcast %cst_5 : f32 to vector<8x512xf32>
    %7 = arith.mulf %6, %5 : vector<8x512xf32>
    %8 = arith.maximumf %5, %7 : vector<8x512xf32>
    %9 = arith.truncf %8 : vector<8x512xf32> to vector<8x512xbf16>
    %c0_6 = arith.constant 0 : index
    %c0_7 = arith.constant 0 : index
    %10 = vector.load %arg4[%c0_6, %c0_7] : memref<512x256xbf16, #tpu.memory_space<vmem>>, vector<512x256xbf16>
    %cst_8 = arith.constant dense<0.000000e+00> : vector<8x256xf32>
    %11 = tpu.matmul %9, %10, %cst_8 {dimension_numbers = #tpu.dot_dimension_numbers<[1], [0], [0], [1], [0, 0, 1, 1], [], []>} : vector<8x512xbf16>, vector<512x256xbf16>, vector<8x256xf32> -> vector<8x256xf32>
    %c0_9 = arith.constant 0 : index
    %c0_10 = arith.constant 0 : index
    %12 = vector.load %arg5[%c0_9, %c0_10] : memref<1x256xf32, #tpu.memory_space<vmem>>, vector<1x256xf32>
    %13 = vector.broadcast %12 : vector<1x256xf32> to vector<8x256xf32>
    %14 = arith.addf %11, %13 : vector<8x256xf32>
    %cst_11 = arith.constant 2.000000e-01 : f32
    %15 = vector.broadcast %cst_11 : f32 to vector<8x256xf32>
    %16 = arith.mulf %15, %14 : vector<8x256xf32>
    %17 = arith.maximumf %14, %16 : vector<8x256xf32>
    %c0_12 = arith.constant 0 : index
    %c0_13 = arith.constant 0 : index
    %18 = vector.load %arg6[%c0_12, %c0_13] : memref<1x256xbf16, #tpu.memory_space<vmem>>, vector<1x256xbf16>
    %19 = arith.extf %18 : vector<1x256xbf16> to vector<1x256xf32>
    %20 = vector.broadcast %19 : vector<1x256xf32> to vector<8x256xf32>
    %21 = arith.mulf %17, %20 : vector<8x256xf32>
    %cst_14 = arith.constant dense<0.000000e+00> : vector<8xf32>
    %22 = vector.multi_reduction <add>, %21, %cst_14 [1] : vector<8x256xf32> to vector<8xf32>
    %23 = vector.shape_cast %22 : vector<8xf32> to vector<8x1xf32>
    %c0_15 = arith.constant 0 : index
    %c0_16 = arith.constant 0 : index
    %24 = vector.load %arg7[%c0_15, %c0_16] : memref<1x1xf32, #tpu.memory_space<vmem>>, vector<1x1xf32>
    %25 = vector.broadcast %24 : vector<1x1xf32> to vector<8x1xf32>
    %26 = arith.addf %23, %25 : vector<8x1xf32>
    %cst_17 = arith.constant 0.000000e+00 : f32
    %27 = vector.broadcast %cst_17 : f32 to vector<8x1xf32>
    %28 = arith.subf %27, %26 : vector<8x1xf32>
    %29 = math.exp %28 : vector<8x1xf32>
    %cst_18 = arith.constant 1.000000e+00 : f32
    %30 = vector.broadcast %cst_18 : f32 to vector<8x1xf32>
    %31 = arith.addf %30, %29 : vector<8x1xf32>
    %32 = tpu.reciprocal %31 {approx = true} : vector<8x1xf32> -> vector<8x1xf32>
    %c0_19 = arith.constant 0 : index
    %c0_20 = arith.constant 0 : index
    %33 = vector.load %arg8[%c0_19, %c0_20] : memref<8x1xf32, #tpu.memory_space<vmem>>, vector<8x1xf32>
    tpu.vector_store %arg8[%c0_19, %c0_20], %32 {strides = array<i32>} : memref<8x1xf32, #tpu.memory_space<vmem>>, vector<8x1xf32>,
    return
  }
  func.func @transform_0(%arg0: i32) -> (i32, i32) {
    %c0_i32 = arith.constant 0 : i32
    %c0_i32_0 = arith.constant 0 : i32
    return %arg0, %c0_i32 : i32, i32
  }
  func.func @transform_1(%arg0: i32) -> (i32, i32) {
    %c0_i32 = arith.constant 0 : i32
    %c0_i32_0 = arith.constant 0 : i32
    %c0_i32_1 = arith.constant 0 : i32
    return %c0_i32, %c0_i32_0 : i32, i32
  }
  func.func @transform_2(%arg0: i32) -> (i32, i32) {
    %c0_i32 = arith.constant 0 : i32
    %c0_i32_0 = arith.constant 0 : i32
    %c0_i32_1 = arith.constant 0 : i32
    return %c0_i32, %c0_i32_0 : i32, i32
  }
  func.func @transform_3(%arg0: i32) -> (i32, i32) {
    %c0_i32 = arith.constant 0 : i32
    %c0_i32_0 = arith.constant 0 : i32
    %c0_i32_1 = arith.constant 0 : i32
    return %c0_i32, %c0_i32_0 : i32, i32
  }
  func.func @transform_4(%arg0: i32) -> (i32, i32) {
    %c0_i32 = arith.constant 0 : i32
    %c0_i32_0 = arith.constant 0 : i32
    %c0_i32_1 = arith.constant 0 : i32
    return %c0_i32, %c0_i32_0 : i32, i32
  }
  func.func @transform_5(%arg0: i32) -> (i32, i32) {
    %c0_i32 = arith.constant 0 : i32
    %c0_i32_0 = arith.constant 0 : i32
    %c0_i32_1 = arith.constant 0 : i32
    return %c0_i32, %c0_i32_0 : i32, i32
  }
  func.func @transform_6(%arg0: i32) -> (i32, i32) {
    %c0_i32 = arith.constant 0 : i32
    %c0_i32_0 = arith.constant 0 : i32
    %c0_i32_1 = arith.constant 0 : i32
    return %c0_i32, %c0_i32_0 : i32, i32
  }
  func.func @transform_7(%arg0: i32) -> (i32, i32) {
    %c0_i32 = arith.constant 0 : i32
    %c0_i32_0 = arith.constant 0 : i32
    return %arg0, %c0_i32 : i32, i32
  }
}

</mosaic_0001>

<bundles_post_ra>
// kernel: tpu_custom_call.1
= control target key start
LH: loop header
LB: loop body
LE: loop exit
PB: predicated region body
PF: predicated region fallthrough
CT: control target
= control target key end

     0   :  { %s1651_s0 = inlined_call_operand.hbm [shape: bf16[8,256], index: 0, kind: input, shape index: {}]   ;;  %s1652_s1 = inlined_call_operand.hbm [shape: bf16[256,512], index: 1, kind: input, shape index: {}]   ;;  %s1653_s2 = inlined_call_operand.vmem [shape: f32[1,512], index: 2, kind: input, shape index: {}]   ;;  %s1654_s3 = inlined_call_operand.hbm [shape: bf16[512,256], index: 3, kind: input, shape index: {}]   ;;  %s1655_s4 = inlined_call_operand.vmem [shape: f32[1,256], index: 4, kind: input, shape index: {}]   ;;  %s1656_s5 = inlined_call_operand.vmem [shape: bf16[1,256], index: 5, kind: input, shape index: {}]   ;;  %s1657_s6 = inlined_call_operand.<no memory space> [shape: f32[1,1], index: 6, kind: input, shape index: {}]   ;;  %s1658_s7 = inlined_call_operand.vmem [shape: f32[8,1], index: 7, kind: output, shape index: {}]  }
   0x1   :  { %v12_v0 = vstv %s1657_s6 }
   0x2   :  { %13 = vst [vmem:[#allocation2] sm:$0x1] %v12_v0 }
   0x3   :  { %14 = vsyncpa [#allocation4], 0 }
   0x4   :  { %15 = vsyncpa [#allocation6], 0  ;;  %s1516_s26 = smov [#allocation5]   ;;  %s1446_s30 = scalar_lea.hbm %s1652_s1, 8192 }
   0x5   :  { %s31_s27 = sshll.u32 %s1516_s26, 4  ;;  %p1447_p0 = scmp.ne.s32.totalorder %s1652_s1, %s1446_s30  ;;  %s32_s27 = int_to_ptr.vmem [resolvable:$true] %s31_s27 }
   0x6   :  { %p1450_p1 = scmp.lt.u32.totalorder %s1446_s30, %s1652_s1 }
   0x8   :  { %p1452_p2 = pnand %p1450_p1, %p1447_p0 }
   0xa   :  { %1455 = shalt.err (!%p1452_p2)
}
   0xb   :  { %s1456_s6 = scalar_lea.vmem %s32_s27, 8192  ;;  %p1461_p4 = scmp.lt.s32.totalorder %s32_s27, %s32_s27 }
   0xc   :  { %p1457_p3 = scmp.ne.s32.totalorder %s32_s27, %s1456_s6  ;;  %p1462_p5 = scmp.lt.s32.totalorder %s1456_s6, %s1456_s6 }
   0xe   :  { %p1463_p6 = por %p1462_p5, %p1461_p4 }
  0x10   :  { %p1464_p7 = pnand %p1463_p6, %p1457_p3 }
  0x12   :  { %1467 = shalt.err (!%p1464_p7)
}
  0x13   :  { %s1517_s12 = smov 256   ;;  %s1518_s13 = smov 16  }
  0x14   :  { %37 = dma.hbm_to_vmem [thread:$0]  %s1652_s1, 8192, %s32_s27, [#allocation6], %s1517_s12, %s1517_s12, %s1518_s13  }
  0x15   :  { %s1519_s16 = smov [#allocation3]   ;;  %s1520_s18 = smov [#allocation7]  }
  0x16   :  { %s22_s17 = sshll.u32 %s1519_s16, 4  ;;  %s45_s19 = sshll.u32 %s1520_s18, 4  ;;  %s23_s17 = int_to_ptr.vmem [resolvable:$true] %s22_s17  ;;  %s46_s19 = int_to_ptr.vmem [resolvable:$true] %s45_s19 }
  0x17   :  { %s1468_s22 = scalar_lea.hbm %s1651_s0, 128 }
  0x18   :  { %p1469_p8 = scmp.ne.s32.totalorder %s1651_s0, %s1468_s22  ;;  %p1472_p9 = scmp.lt.u32.totalorder %s1468_s22, %s1651_s0 }
  0x1a   :  { %p1474_p10 = pnand %p1472_p9, %p1469_p8 }
  0x1c   :  { %1477 = shalt.err (!%p1474_p10)
}
  0x1d   :  { %s1478_s1 = scalar_lea.vmem %s23_s17, 128  ;;  %p1483_p12 = scmp.lt.s32.totalorder %s23_s17, %s23_s17 }
  0x1e   :  { %p1479_p11 = scmp.ne.s32.totalorder %s23_s17, %s1478_s1  ;;  %p1484_p13 = scmp.lt.s32.totalorder %s1478_s1, %s1478_s1 }
  0x20   :  { %p1485_p0 = por %p1484_p13, %p1483_p12 }
  0x22   :  { %p1486_p1 = pnand %p1485_p0, %p1479_p11 }
  0x24   :  { %1489 = shalt.err (!%p1486_p1)
}
  0x25   :  { %25 = dma.hbm_to_vmem [thread:$0]  %s1651_s0, 128, %s23_s17, [#allocation4]  }
  0x26   :  { %s1490_s8 = scalar_lea.hbm %s1654_s3, 8192 }
  0x27   :  { %p1491_p2 = scmp.ne.s32.totalorder %s1654_s3, %s1490_s8  ;;  %p1494_p3 = scmp.lt.u32.totalorder %s1490_s8, %s1654_s3 }
  0x29   :  { %p1496_p4 = pnand %p1494_p3, %p1491_p2 }
  0x2b   :  { %1499 = shalt.err (!%p1496_p4)
}
  0x2c   :  { %s1500_s12 = scalar_lea.vmem %s46_s19, 8192  ;;  %p1505_p6 = scmp.lt.s32.totalorder %s46_s19, %s46_s19 }
  0x2d   :  { %p1501_p5 = scmp.ne.s32.totalorder %s46_s19, %s1500_s12  ;;  %p1506_p7 = scmp.lt.s32.totalorder %s1500_s12, %s1500_s12 }
  0x2f   :  { %p1507_p8 = por %p1506_p7, %p1505_p6 }
  0x31   :  { %p1508_p9 = pnand %p1507_p8, %p1501_p5 }
  0x33   :  { %1511 = shalt.err (!%p1508_p9)
}
  0x34   :  { %s1521_s0 = smov 128   ;;  %s1522_s13 = smov 8  }
  0x35   :  { %51 = dma.hbm_to_vmem [thread:$0]  %s1654_s3, 8192, %s46_s19, [#allocation6], %s1521_s0, %s1521_s0, %s1522_s13  }
  0x36   :  { %1512 = dma.done.wait [#allocation4], 128  }
  0x37   :  { %1513 = vsyncadd [#allocation4], 4294967168 }
  0x38   :  { %1514 = dma.done.wait [#allocation6], 16384  }
  0x39   :  { %1515 = vsyncadd [#allocation6], 4294950912  ;;  %v1248_v1 = vld [vmem:[#allocation5 + $0x4] ss:$16 sps:$4 sm:$0xff]   ;;  %v1250_v2 = vld [vmem:[#allocation5] ss:$16 sps:$4 sm:$0xff]  }
  0x3a   :  { %481 = vmatprep.subr.bf16.mxu1 %v1248_v1  ;;  %v1251_v3 = vld [vmem:[#allocation5 + $0x24] ss:$16 sps:$4 sm:$0xff]   ;;  %v1253_v4 = vld [vmem:[#allocation5 + $0x20] ss:$16 sps:$4 sm:$0xff]   ;;  %v1602_v14 = vld [vmem:[#allocation3] sm:$0xff]  ;;  %vm1096_vm0 = vcmask 7168  }
  0x3b   :  { %482 = vmatpush1.bf16.msra.mxu1 %v1250_v2  ;;  %v1254_v5 = vld [vmem:[#allocation5 + $0x44] ss:$16 sps:$4 sm:$0xff]   ;;  %v1256_v6 = vld [vmem:[#allocation5 + $0x40] ss:$16 sps:$4 sm:$0xff]   ;;  %v1606_v15 = vcombine.high %v1602_v14, %v1602_v14  ;;  %v1300_v46 = vld [vmem:[#allocation5 + $0xc] ss:$16 sps:$4 sm:$0xff]   ;;  %v1611_v49 = vcombine.low %v1602_v14, %v1602_v14 }
  0x3c   :  { %483 = vmatprep.subr.bf16.mxu1 %v1251_v3  ;;  %v1257_v7 = vld [vmem:[#allocation5 + $0x64] ss:$16 sps:$4 sm:$0xff]   ;;  %v1259_v8 = vld [vmem:[#allocation5 + $0x60] ss:$16 sps:$4 sm:$0xff]   ;;  %v1298_v47 = vld [vmem:[#allocation5 + $0x8] ss:$16 sps:$4 sm:$0xff]  }
  0x3d   :  { %v1260_v9 = vld [vmem:[#allocation5 + $0x84] ss:$16 sps:$4 sm:$0xff]   ;;  %v1262_v10 = vld [vmem:[#allocation5 + $0x80] ss:$16 sps:$4 sm:$0xff]   ;;  %513 = vmatprep.mubr.bf16.mxu1 %v1606_v15  ;;  %v1303_v50 = vld [vmem:[#allocation5 + $0x2c] ss:$16 sps:$4 sm:$0xff]  }
  0x3e   :  { %v1263_v11 = vld [vmem:[#allocation5 + $0xa4] ss:$16 sps:$4 sm:$0xff]   ;;  %v1265_v12 = vld [vmem:[#allocation5 + $0xa0] ss:$16 sps:$4 sm:$0xff]   ;;  %v1301_v53 = vld [vmem:[#allocation5 + $0x28] ss:$16 sps:$4 sm:$0xff]  }
  0x3f   :  { %484 = vmatpush1.bf16.msra.mxu1 %v1253_v4  ;;  %v1266_v13 = vld [vmem:[#allocation5 + $0xc4] ss:$16 sps:$4 sm:$0xff]   ;;  %v1268_v16 = vld [vmem:[#allocation5 + $0xc0] ss:$16 sps:$4 sm:$0xff]   ;;  %v1306_v55 = vld [vmem:[#allocation5 + $0x4c] ss:$16 sps:$4 sm:$0xff]  }
  0x40   :  { %485 = vmatprep.subr.bf16.mxu1 %v1254_v5  ;;  %v1269_v17 = vld [vmem:[#allocation5 + $0xe4] ss:$16 sps:$4 sm:$0xff]   ;;  %v1271_v18 = vld [vmem:[#allocation5 + $0xe0] ss:$16 sps:$4 sm:$0xff]   ;;  %v1304_v57 = vld [vmem:[#allocation5 + $0x48] ss:$16 sps:$4 sm:$0xff]  }
  0x41   :  { %v1272_v19 = vld [vmem:[#allocation5 + $0x104] ss:$16 sps:$4 sm:$0xff]   ;;  %v1274_v20 = vld [vmem:[#allocation5 + $0x100] ss:$16 sps:$4 sm:$0xff]   ;;  %v1309_v59 = vld [vmem:[#allocation5 + $0x6c] ss:$16 sps:$4 sm:$0xff]  }
  0x42   :  { %v1275_v21 = vld [vmem:[#allocation5 + $0x124] ss:$16 sps:$4 sm:$0xff]   ;;  %v1277_v22 = vld [vmem:[#allocation5 + $0x120] ss:$16 sps:$4 sm:$0xff]   ;;  %v1307_v61 = vld [vmem:[#allocation5 + $0x68] ss:$16 sps:$4 sm:$0xff]  }
  0x43   :  { %486 = vmatpush1.bf16.msra.mxu1 %v1256_v6  ;;  %v1278_v23 = vld [vmem:[#allocation5 + $0x144] ss:$16 sps:$4 sm:$0xff]   ;;  %v1280_v24 = vld [vmem:[#allocation5 + $0x140] ss:$16 sps:$4 sm:$0xff]   ;;  %v1312_v63 = vld [vmem:[#allocation5 + $0x8c] ss:$16 sps:$4 sm:$0xff]  }
  0x44   :  { %487 = vmatprep.subr.bf16.mxu1 %v1257_v7  ;;  %v1281_v25 = vld [vmem:[#allocation5 + $0x164] ss:$16 sps:$4 sm:$0xff]   ;;  %v1283_v26 = vld [vmem:[#allocation5 + $0x160] ss:$16 sps:$4 sm:$0xff]   ;;  %v1310_v1 = vld [vmem:[#allocation5 + $0x88] ss:$16 sps:$4 sm:$0xff]  }
  0x45   :  { %v1284_v27 = vld [vmem:[#allocation5 + $0x184] ss:$16 sps:$4 sm:$0xff]   ;;  %v1348_v29 = vld [vmem:[#allocation7] ss:$8 sps:$4 sm:$0xff]   ;;  %v1351_v32 = vld [vmem:[#allocation7 + $0x10] ss:$8 sps:$4 sm:$0xff]  }
  0x46   :  { %v1346_v28 = vld [vmem:[#allocation7 + $0x4] ss:$8 sps:$4 sm:$0xff]   ;;  %v1349_v30 = vld [vmem:[#allocation7 + $0x14] ss:$8 sps:$4 sm:$0xff]   ;;  %v1286_v31 = vld [vmem:[#allocation5 + $0x180] ss:$16 sps:$4 sm:$0xff]  }
  0x47   :  { %488 = vmatpush1.bf16.msra.mxu1 %v1259_v8  ;;  %971 = vmatprep.subr.bf16.mxu0 %v1346_v28  ;;  %v1352_v33 = vld [vmem:[#allocation7 + $0x24] ss:$8 sps:$4 sm:$0xff]   ;;  %v1289_v35 = vld [vmem:[#allocation5 + $0x1a0] ss:$16 sps:$4 sm:$0xff]   ;;  %v1355_v37 = vld [vmem:[#allocation7 + $0x34] ss:$8 sps:$4 sm:$0xff]  }
  0x48   :  { %489 = vmatprep.subr.bf16.mxu1 %v1260_v9  ;;  %972 = vmatpush1.bf16.msra.mxu0 %v1348_v29  ;;  %v1287_v34 = vld [vmem:[#allocation5 + $0x1a4] ss:$16 sps:$4 sm:$0xff]   ;;  %v1354_v36 = vld [vmem:[#allocation7 + $0x20] ss:$8 sps:$4 sm:$0xff]   ;;  %v1357_v40 = vld [vmem:[#allocation7 + $0x30] ss:$8 sps:$4 sm:$0xff]  }
  0x49   :  { %973 = vmatprep.subr.bf16.mxu0 %v1349_v30  ;;  %v1290_v38 = vld [vmem:[#allocation5 + $0x1c4] ss:$16 sps:$4 sm:$0xff]   ;;  %v1292_v39 = vld [vmem:[#allocation5 + $0x1c0] ss:$16 sps:$4 sm:$0xff]   ;;  %v1315_v3 = vld [vmem:[#allocation5 + $0xac] ss:$16 sps:$4 sm:$0xff]  }
  0x4a   :  { %v1358_v41 = vld [vmem:[#allocation7 + $0x44] ss:$8 sps:$4 sm:$0xff]   ;;  %v1295_v43 = vld [vmem:[#allocation5 + $0x1e0] ss:$16 sps:$4 sm:$0xff]   ;;  %v1361_v45 = vld [vmem:[#allocation7 + $0x54] ss:$8 sps:$4 sm:$0xff]  }
  0x4b   :  { %490 = vmatpush1.bf16.msra.mxu1 %v1262_v10  ;;  %v1293_v42 = vld [vmem:[#allocation5 + $0x1e4] ss:$16 sps:$4 sm:$0xff]   ;;  %v1360_v44 = vld [vmem:[#allocation7 + $0x40] ss:$8 sps:$4 sm:$0xff]   ;;  %v1363_v48 = vld [vmem:[#allocation7 + $0x50] ss:$8 sps:$4 sm:$0xff]  }
  0x4c   :  { %491 = vmatprep.subr.bf16.mxu1 %v1263_v11  ;;  %974 = vmatpush1.bf16.msra.mxu0 %v1351_v32  ;;  %v1364_v51 = vld [vmem:[#allocation7 + $0x64] ss:$8 sps:$4 sm:$0xff]   ;;  %v1366_v52 = vld [vmem:[#allocation7 + $0x60] ss:$8 sps:$4 sm:$0xff]   ;;  %v1367_v54 = vld [vmem:[#allocation7 + $0x74] ss:$8 sps:$4 sm:$0xff]  }
  0x4d   :  { %975 = vmatprep.subr.bf16.mxu0 %v1352_v33  ;;  %v1369_v56 = vld [vmem:[#allocation7 + $0x70] ss:$8 sps:$4 sm:$0xff]   ;;  %v1370_v58 = vld [vmem:[#allocation7 + $0x84] ss:$8 sps:$4 sm:$0xff]   ;;  %v1372_v60 = vld [vmem:[#allocation7 + $0x80] ss:$8 sps:$4 sm:$0xff]  }
  0x4e   :  { %v1373_v62 = vld [vmem:[#allocation7 + $0x94] ss:$8 sps:$4 sm:$0xff]   ;;  %v1375_v0 = vld [vmem:[#allocation7 + $0x90] ss:$8 sps:$4 sm:$0xff]   ;;  %v1376_v2 = vld [vmem:[#allocation7 + $0xa4] ss:$8 sps:$4 sm:$0xff]  }
  0x4f   :  { %492 = vmatpush1.bf16.msra.mxu1 %v1265_v12  ;;  %v1378_v4 = vld [vmem:[#allocation7 + $0xa0] ss:$8 sps:$4 sm:$0xff]   ;;  %v1379_v6 = vld [vmem:[#allocation7 + $0xb4] ss:$8 sps:$4 sm:$0xff]   ;;  %v1381_v8 = vld [vmem:[#allocation7 + $0xb0] ss:$8 sps:$4 sm:$0xff]  }
  0x50   :  { %493 = vmatprep.subr.bf16.mxu1 %v1266_v13  ;;  %976 = vmatpush1.bf16.msra.mxu0 %v1354_v36  ;;  %v1313_v5 = vld [vmem:[#allocation5 + $0xa8] ss:$16 sps:$4 sm:$0xff]   ;;  %v1318_v7 = vld [vmem:[#allocation5 + $0xcc] ss:$16 sps:$4 sm:$0xff]  }
  0x51   :  { %977 = vmatprep.subr.bf16.mxu0 %v1355_v37  ;;  %v1316_v9 = vld [vmem:[#allocation5 + $0xc8] ss:$16 sps:$4 sm:$0xff]   ;;  %v1382_v10 = vld [vmem:[#allocation7 + $0xc4] ss:$8 sps:$4 sm:$0xff]   ;;  %v1385_v14 = vld [vmem:[#allocation7 + $0xd4] ss:$8 sps:$4 sm:$0xff]   ;;  %v134_v37 = vlaneseq }
  0x52   :  { %v1321_v11 = vld [vmem:[#allocation5 + $0xec] ss:$16 sps:$4 sm:$0xff]   ;;  %v1384_v12 = vld [vmem:[#allocation7 + $0xc0] ss:$8 sps:$4 sm:$0xff]  }
  0x53   :  { %494 = vmatpush1.bf16.msra.mxu1 %v1268_v16  ;;  %v1319_v13 = vld [vmem:[#allocation5 + $0xe8] ss:$16 sps:$4 sm:$0xff]   ;;  %v1345_v29 = vld [vmem:[#allocation5 + $0x1ec] ss:$16 sps:$4 sm:$0xff]  }
  0x54   :  { %495 = vmatprep.subr.bf16.mxu1 %v1269_v17  ;;  %978 = vmatpush1.bf16.msra.mxu0 %v1357_v40  ;;  %v1322_v16 = vld [vmem:[#allocation5 + $0x108] ss:$16 sps:$4 sm:$0xff]   ;;  %v1327_v17 = vld [vmem:[#allocation5 + $0x12c] ss:$16 sps:$4 sm:$0xff]  }
  0x55   :  { %979 = vmatprep.subr.bf16.mxu0 %v1358_v41  ;;  %v1340_v28 = vld [vmem:[#allocation5 + $0x1c8] ss:$16 sps:$4 sm:$0xff]   ;;  %v1388_v32 = vld [vmem:[#allocation7 + $0xe4] ss:$8 sps:$4 sm:$0xff]  }
  0x56   :  { %v1343_v30 = vld [vmem:[#allocation5 + $0x1e8] ss:$16 sps:$4 sm:$0xff]   ;;  %v1396_v36 = vld [vmem:[#allocation7 + $0x104] ss:$8 sps:$4 sm:$0xff]  }
  0x57   :  { %496 = vmatpush1.bf16.msra.mxu1 %v1271_v18  ;;  %v1325_v18 = vld [vmem:[#allocation5 + $0x128] ss:$16 sps:$4 sm:$0xff]  }
  0x58   :  { %497 = vmatprep.subr.bf16.mxu1 %v1272_v19  ;;  %980 = vmatpush1.bf16.msra.mxu0 %v1360_v44  ;;  %v1330_v19 = vld [vmem:[#allocation5 + $0x14c] ss:$16 sps:$4 sm:$0xff]   ;;  %v1390_v33 = vld [vmem:[#allocation7 + $0xe0] ss:$8 sps:$4 sm:$0xff]   ;;  %v1624_v40 = vld [vmem:[%s1653_s2] sm:$0xf] }
  0x59   :  { %981 = vmatprep.subr.bf16.mxu0 %v1361_v45 }
  0x5b   :  { %498 = vmatpush1.bf16.msra.mxu1 %v1274_v20  ;;  %v1328_v20 = vld [vmem:[#allocation5 + $0x148] ss:$16 sps:$4 sm:$0xff]  }
  0x5c   :  { %499 = vmatprep.subr.bf16.mxu1 %v1275_v21  ;;  %982 = vmatpush1.bf16.msra.mxu0 %v1363_v48  ;;  %v1333_v21 = vld [vmem:[#allocation5 + $0x16c] ss:$16 sps:$4 sm:$0xff]  }
  0x5d   :  { %983 = vmatprep.subr.bf16.mxu0 %v1364_v51 }
  0x5f   :  { %500 = vmatpush1.bf16.msra.mxu1 %v1277_v22  ;;  %v1331_v22 = vld [vmem:[#allocation5 + $0x168] ss:$16 sps:$4 sm:$0xff]  }
  0x60   :  { %501 = vmatprep.subr.bf16.mxu1 %v1278_v23  ;;  %984 = vmatpush1.bf16.msra.mxu0 %v1366_v52  ;;  %v1336_v23 = vld [vmem:[#allocation5 + $0x18c] ss:$16 sps:$4 sm:$0xff]  }
  0x61   :  { %985 = vmatprep.subr.bf16.mxu0 %v1367_v54 }
  0x63   :  { %502 = vmatpush1.bf16.msra.mxu1 %v1280_v24  ;;  %v1334_v24 = vld [vmem:[#allocation5 + $0x188] ss:$16 sps:$4 sm:$0xff]  }
  0x64   :  { %503 = vmatprep.subr.bf16.mxu1 %v1281_v25  ;;  %986 = vmatpush1.bf16.msra.mxu0 %v1369_v56  ;;  %v1339_v25 = vld [vmem:[#allocation5 + $0x1ac] ss:$16 sps:$4 sm:$0xff]  }
  0x65   :  { %987 = vmatprep.subr.bf16.mxu0 %v1370_v58  ;;  %v1397_v58 = vld [vmem:[#allocation7 + $0x110] ss:$8 sps:$4 sm:$0xff]  }
  0x67   :  { %504 = vmatpush1.bf16.msra.mxu1 %v1283_v26  ;;  %v1337_v26 = vld [vmem:[#allocation5 + $0x1a8] ss:$16 sps:$4 sm:$0xff]  }
  0x68   :  { %505 = vmatprep.subr.bf16.mxu1 %v1284_v27  ;;  %988 = vmatpush1.bf16.msra.mxu0 %v1372_v60  ;;  %v1342_v27 = vld [vmem:[#allocation5 + $0x1cc] ss:$16 sps:$4 sm:$0xff]   ;;  %v1400_v60 = vld [vmem:[#allocation7 + $0x120] ss:$8 sps:$4 sm:$0xff]  }
  0x69   :  { %989 = vmatprep.subr.bf16.mxu0 %v1373_v62  ;;  %v1403_v62 = vld [vmem:[#allocation7 + $0x130] ss:$8 sps:$4 sm:$0xff]  }
  0x6b   :  { %506 = vmatpush1.bf16.msra.mxu1 %v1286_v31  ;;  %v1387_v31 = vld [vmem:[#allocation7 + $0xd0] ss:$8 sps:$4 sm:$0xff]  }
  0x6c   :  { %507 = vmatprep.subr.bf16.mxu1 %v1287_v34  ;;  %990 = vmatpush1.bf16.msra.mxu0 %v1375_v0  ;;  %v1391_v34 = vld [vmem:[#allocation7 + $0xf4] ss:$8 sps:$4 sm:$0xff]   ;;  %v1406_v0 = vld [vmem:[#allocation7 + $0x140] ss:$8 sps:$4 sm:$0xff]  }
  0x6d   :  { %991 = vmatprep.subr.bf16.mxu0 %v1376_v2  ;;  %v1409_v2 = vld [vmem:[#allocation7 + $0x150] ss:$8 sps:$4 sm:$0xff]  }
  0x6f   :  { %508 = vmatpush1.bf16.msra.mxu1 %v1289_v35  ;;  %v1393_v35 = vld [vmem:[#allocation7 + $0xf0] ss:$8 sps:$4 sm:$0xff]  }
  0x70   :  { %509 = vmatprep.subr.bf16.mxu1 %v1290_v38  ;;  %992 = vmatpush1.bf16.msra.mxu0 %v1378_v4  ;;  %v1616_v38 = vshrl.u32 %v134_v37, 7  ;;  %v1412_v4 = vld [vmem:[#allocation7 + $0x160] ss:$8 sps:$4 sm:$0xff]  }
  0x71   :  { %993 = vmatprep.subr.bf16.mxu0 %v1379_v6  ;;  %v1415_v6 = vld [vmem:[#allocation7 + $0x170] ss:$8 sps:$4 sm:$0xff]  }
  0x72   :  { %v140_v41 = vsub.s32 1, %v1616_v38 }
  0x73   :  { %510 = vmatpush1.bf16.msra.mxu1 %v1292_v39  ;;  %v1619_v39 = vsub.s32 0, %v1616_v38 }
  0x74   :  { %511 = vmatprep.subr.bf16.mxu1 %v1293_v42  ;;  %994 = vmatpush1.bf16.msra.mxu0 %v1381_v8  ;;  %v1418_v8 = vld [vmem:[#allocation7 + $0x180] ss:$8 sps:$4 sm:$0xff]  }
  0x75   :  { %995 = vmatprep.subr.bf16.mxu0 %v1382_v10  ;;  %v137_v42 = vrot.slane %v1624_v40, %v1619_v39  ;;  %v1421_v10 = vld [vmem:[#allocation7 + $0x190] ss:$8 sps:$4 sm:$0xff]  }
  0x77   :  { %512 = vmatpush1.bf16.msra.mxu1 %v1295_v43  ;;  %v141_v43 = vrot.slane %v1624_v40, %v140_v41 }
  0x78   :  { %522 = vmatprep.subr.bf16.mxu1 %v1300_v46  ;;  %996 = vmatpush1.bf16.msra.mxu0 %v1384_v12  ;;  %v1424_v12 = vld [vmem:[#allocation7 + $0x1a0] ss:$8 sps:$4 sm:$0xff]  }
  0x79   :  { %997 = vmatprep.subr.bf16.mxu0 %v1385_v14  ;;  %v1427_v14 = vld [vmem:[#allocation7 + $0x1b0] ss:$8 sps:$4 sm:$0xff]  }
  0x7a   :  { %514 = vmatmul.mubr.bf16.vlgmr.msra.gmra.mrb[0].mxu1 %v1611_v49 }
  0x7b   :  { %523 = vmatpush1.bf16.msra.mxu1 %v1298_v47  ;;  %554 = vmatprep.mubr.bf16.mxu1 %v1606_v15  ;;  %v1324_v15 = vld [vmem:[#allocation5 + $0x10c] ss:$16 sps:$4 sm:$0xff]  }
  0x7c   :  { %524 = vmatprep.subr.bf16.mxu1 %v1303_v50  ;;  %998 = vmatpush1.bf16.msra.mxu0 %v1387_v31 }
  0x7d   :  { %999 = vmatprep.subr.bf16.mxu0 %v1388_v32 }
  0x7f   :  { %525 = vmatpush1.bf16.msra.mxu1 %v1301_v53 }
  0x80   :  { %526 = vmatprep.subr.bf16.mxu1 %v1306_v55  ;;  %1000 = vmatpush1.bf16.msra.mxu0 %v1390_v33  ;;  %v1394_v55 = vld [vmem:[#allocation7 + $0x100] ss:$8 sps:$4 sm:$0xff]  }
  0x81   :  { %1001 = vmatprep.subr.bf16.mxu0 %v1391_v34  ;;  %v1439_v34 = vld [vmem:[#allocation7 + $0x1f0] ss:$8 sps:$4 sm:$0xff]  }
  0x83   :  { %527 = vmatpush1.bf16.msra.mxu1 %v1304_v57  ;;  %v1399_v57 = vld [vmem:[#allocation7 + $0x114] ss:$8 sps:$4 sm:$0xff]  }
  0x84   :  { %528 = vmatprep.subr.bf16.mxu1 %v1309_v59  ;;  %1002 = vmatpush1.bf16.msra.mxu0 %v1393_v35  ;;  %v1402_v59 = vld [vmem:[#allocation7 + $0x124] ss:$8 sps:$4 sm:$0xff]  }
  0x85   :  { %1012 = vmatprep.subr.bf16.mxu0 %v1396_v36 }
  0x87   :  { %529 = vmatpush1.bf16.msra.mxu1 %v1307_v61  ;;  %v1405_v61 = vld [vmem:[#allocation7 + $0x134] ss:$8 sps:$4 sm:$0xff]  }
  0x88   :  { %530 = vmatprep.subr.bf16.mxu1 %v1312_v63  ;;  %v1408_v63 = vld [vmem:[#allocation7 + $0x144] ss:$8 sps:$4 sm:$0xff]  }
  0x8b   :  { %531 = vmatpush1.bf16.msra.mxu1 %v1310_v1  ;;  %v1411_v1 = vld [vmem:[#allocation7 + $0x154] ss:$8 sps:$4 sm:$0xff]  }
  0x8c   :  { %532 = vmatprep.subr.bf16.mxu1 %v1315_v3  ;;  %v1414_v3 = vld [vmem:[#allocation7 + $0x164] ss:$8 sps:$4 sm:$0xff]  }
  0x8f   :  { %533 = vmatpush1.bf16.msra.mxu1 %v1313_v5  ;;  %v1417_v5 = vld [vmem:[#allocation7 + $0x174] ss:$8 sps:$4 sm:$0xff]  }
  0x90   :  { %534 = vmatprep.subr.bf16.mxu1 %v1318_v7  ;;  %v1420_v7 = vld [vmem:[#allocation7 + $0x184] ss:$8 sps:$4 sm:$0xff]  }
  0x93   :  { %535 = vmatpush1.bf16.msra.mxu1 %v1316_v9  ;;  %v1423_v9 = vld [vmem:[#allocation7 + $0x194] ss:$8 sps:$4 sm:$0xff]  }
  0x94   :  { %536 = vmatprep.subr.bf16.mxu1 %v1321_v11  ;;  %v1426_v11 = vld [vmem:[#allocation7 + $0x1a4] ss:$8 sps:$4 sm:$0xff]  }
  0x97   :  { %537 = vmatpush1.bf16.msra.mxu1 %v1319_v13  ;;  %v1429_v13 = vld [vmem:[#allocation7 + $0x1b4] ss:$8 sps:$4 sm:$0xff]  }
  0x98   :  { %538 = vmatprep.subr.bf16.mxu1 %v1324_v15  ;;  %v1432_v15 = vld [vmem:[#allocation7 + $0x1c4] ss:$8 sps:$4 sm:$0xff]  }
  0x9b   :  { %539 = vmatpush1.bf16.msra.mxu1 %v1322_v16  ;;  %v1430_v16 = vld [vmem:[#allocation7 + $0x1c0] ss:$8 sps:$4 sm:$0xff]  }
  0x9c   :  { %540 = vmatprep.subr.bf16.mxu1 %v1327_v17  ;;  %v1435_v17 = vld [vmem:[#allocation7 + $0x1d4] ss:$8 sps:$4 sm:$0xff]  }
  0x9f   :  { %541 = vmatpush1.bf16.msra.mxu1 %v1325_v18  ;;  %v144_v18 = vsub.s32 2, %v1616_v38 }
  0xa0   :  { %542 = vmatprep.subr.bf16.mxu1 %v1330_v19  ;;  %v148_v19 = vsub.s32 3, %v1616_v38 }
  0xa3   :  { %543 = vmatpush1.bf16.msra.mxu1 %v1328_v20  ;;  %v1433_v20 = vld [vmem:[#allocation7 + $0x1d0] ss:$8 sps:$4 sm:$0xff]  }
  0xa4   :  { %544 = vmatprep.subr.bf16.mxu1 %v1333_v21  ;;  %v145_v21 = vrot.slane %v1624_v40, %v144_v18 }
  0xa7   :  { %545 = vmatpush1.bf16.msra.mxu1 %v1331_v22  ;;  %v1438_v22 = vld [vmem:[#allocation7 + $0x1e4] ss:$8 sps:$4 sm:$0xff]  }
  0xa8   :  { %546 = vmatprep.subr.bf16.mxu1 %v1336_v23  ;;  %v149_v23 = vrot.slane %v1624_v40, %v148_v19 }
  0xab   :  { %547 = vmatpush1.bf16.msra.mxu1 %v1334_v24 }
  0xac   :  { %548 = vmatprep.subr.bf16.mxu1 %v1339_v25  ;;  %v1436_v25 = vld [vmem:[#allocation7 + $0x1e0] ss:$8 sps:$4 sm:$0xff]  }
  0xaf   :  { %549 = vmatpush1.bf16.msra.mxu1 %v1337_v26 }
  0xb0   :  { %550 = vmatprep.subr.bf16.mxu1 %v1342_v27 }
  0xb3   :  { %551 = vmatpush1.bf16.msra.mxu1 %v1340_v28  ;;  %v1441_v28 = vld [vmem:[#allocation7 + $0x1f4] ss:$8 sps:$4 sm:$0xff]  }
  0xb4   :  { %552 = vmatprep.subr.bf16.mxu1 %v1345_v29 }
  0xb7   :  { %553 = vmatpush1.bf16.msra.mxu1 %v1343_v30 }
  0xba   :  { %555 = vmatmul.mubr.bf16.vlgmr.msra.gmra.mrb[4].mxu1 %v1611_v49 }
 0x14d   :  { %v515_v44 = vpop.f32.mrb[0].mxu1 }
 0x14e   :  { %v516_v45 = vadd.f32 %v515_v44, %v137_v42  ;;  %v517_v46 = vpop.f32.mrb[1].mxu1  ;;  %v1057_v42 = vld [vmem:[%s1656_s5] sm:$0x3] }
 0x14f   :  { %v518_v47 = vadd.f32 %v517_v46, %v141_v43  ;;  %v519_v48 = vpop.f32.mrb[2].mxu1  ;;  %v639_v43 = vld [vmem:[%s1655_s4] sm:$0x3]  ;;  %v1058_v44 = vunpack.c.l.bf16 %v1057_v42 }
 0x150   :  { %v563_v49 = vmul.f32 0.2, %v516_v45  ;;  %v520_v50 = vpop.f32.mrb[3].mxu1  ;;  %v648_v46 = vrot.slane %v639_v43, %v140_v41 }
 0x151   :  { %v564_v51 = vmul.f32 0.2, %v518_v47 }
 0x152   :  { %v567_v52 = vmax.f32 %v516_v45, %v563_v49  ;;  %v644_v45 = vrot.slane %v639_v43, %v1619_v39  ;;  %v1067_v49 = vrot.slane %v1058_v44, %v144_v18 }
 0x153   :  { %v568_v53 = vmax.f32 %v518_v47, %v564_v51  ;;  %v1063_v47 = vrot.slane %v1058_v44, %v1619_v39 }
 0x154   :  { %v571_v56 = vpack.c.bf16 %v567_v52, %v567_v52 }
 0x155   :  { %v572_v54 = vpack.c.bf16 %v568_v53, %v568_v53 }
 0x157   :  { %1003 = vmatprep.mubr.bf16.mxu0 %v572_v54 }
 0x158   :  { %1004 = vmatmul.mubr.bf16.vlgmr.msra.gmra.mrb[0].mxu0 %v571_v56  ;;  %v1073_v56 = vrot.slane %v1063_v47, %v1619_v39 }
 0x159   :  { %1013 = vmatpush1.bf16.msra.mxu0 %v1394_v55 }
 0x15a   :  { %1014 = vmatprep.subr.bf16.mxu0 %v1399_v57 }
 0x15d   :  { %1015 = vmatpush1.bf16.msra.mxu0 %v1397_v58  ;;  %v1077_v58 = vrot.slane %v1067_v49, %v1619_v39 }
 0x15e   :  { %1016 = vmatprep.subr.bf16.mxu0 %v1402_v59 }
 0x161   :  { %1017 = vmatpush1.bf16.msra.mxu0 %v1400_v60 }
 0x162   :  { %1018 = vmatprep.subr.bf16.mxu0 %v1405_v61 }
 0x165   :  { %1019 = vmatpush1.bf16.msra.mxu0 %v1403_v62  ;;  %v1234_v62 = vld [vmem:[#allocation2] ss:$0 sm:$0xff] }
 0x166   :  { %1020 = vmatprep.subr.bf16.mxu0 %v1408_v63 }
 0x169   :  { %1021 = vmatpush1.bf16.msra.mxu0 %v1406_v0 }
 0x16a   :  { %1022 = vmatprep.subr.bf16.mxu0 %v1411_v1 }
 0x16d   :  { %1023 = vmatpush1.bf16.msra.mxu0 %v1409_v2 }
 0x16e   :  { %1024 = vmatprep.subr.bf16.mxu0 %v1414_v3 }
 0x171   :  { %1025 = vmatpush1.bf16.msra.mxu0 %v1412_v4 }
 0x172   :  { %1026 = vmatprep.subr.bf16.mxu0 %v1417_v5 }
 0x175   :  { %1027 = vmatpush1.bf16.msra.mxu0 %v1415_v6 }
 0x176   :  { %1028 = vmatprep.subr.bf16.mxu0 %v1420_v7 }
 0x179   :  { %1029 = vmatpush1.bf16.msra.mxu0 %v1418_v8 }
 0x17a   :  { %1030 = vmatprep.subr.bf16.mxu0 %v1423_v9 }
 0x17d   :  { %1031 = vmatpush1.bf16.msra.mxu0 %v1421_v10 }
 0x17e   :  { %1032 = vmatprep.subr.bf16.mxu0 %v1426_v11 }
 0x181   :  { %1033 = vmatpush1.bf16.msra.mxu0 %v1424_v12 }
 0x182   :  { %1034 = vmatprep.subr.bf16.mxu0 %v1429_v13 }
 0x185   :  { %1035 = vmatpush1.bf16.msra.mxu0 %v1427_v14 }
 0x186   :  { %1036 = vmatprep.subr.bf16.mxu0 %v1432_v15 }
 0x189   :  { %1037 = vmatpush1.bf16.msra.mxu0 %v1430_v16 }
 0x18a   :  { %1038 = vmatprep.subr.bf16.mxu0 %v1435_v17 }
 0x18d   :  { %v556_v24 = vpop.f32.mrb[4].mxu1  ;;  %1039 = vmatpush1.bf16.msra.mxu0 %v1433_v20 }
 0x18e   :  { %v557_v26 = vadd.f32 %v556_v24, %v145_v21  ;;  %v558_v27 = vpop.f32.mrb[5].mxu1  ;;  %1040 = vmatprep.subr.bf16.mxu0 %v1438_v22 }
 0x18f   :  { %v559_v29 = vadd.f32 %v558_v27, %v149_v23  ;;  %v560_v30 = vpop.f32.mrb[6].mxu1 }
 0x190   :  { %v565_v31 = vmul.f32 0.2, %v557_v26  ;;  %v561_v32 = vpop.f32.mrb[7].mxu1 }
 0x191   :  { %v566_v33 = vmul.f32 0.2, %v559_v29  ;;  %1041 = vmatpush1.bf16.msra.mxu0 %v1436_v25 }
 0x192   :  { %v569_v35 = vmax.f32 %v557_v26, %v565_v31  ;;  %1042 = vmatprep.subr.bf16.mxu0 %v1441_v28 }
 0x193   :  { %v570_v36 = vmax.f32 %v559_v29, %v566_v33 }
 0x194   :  { %v573_v40 = vpack.c.bf16 %v569_v35, %v569_v35 }
 0x195   :  { %v574_v37 = vpack.c.bf16 %v570_v36, %v570_v36  ;;  %1043 = vmatpush1.bf16.msra.mxu0 %v1439_v34 }
 0x197   :  { %1044 = vmatprep.mubr.bf16.mxu0 %v574_v37 }
 0x198   :  { %1045 = vmatmul.mubr.bf16.vlgmr.msra.gmra.mrb[0].mxu0 %v573_v40 }
 0x26b   :  { %v1046_v48 = vpop.f32.mrb[0].mxu0 }
 0x26c   :  { %v1235_v50 = vadd.f32 %v1046_v48, %v644_v45  ;;  %v1048_v51 = vpop.f32.mrb[1].mxu0 }
 0x26d   :  { %v1236_v52 = vadd.f32 %v1048_v51, %v648_v46  ;;  %v1050_v53 = vpop.f32.mrb[2].mxu0 }
 0x26e   :  { %v1053_v54 = vmul.f32 0.2, %v1235_v50  ;;  %v1051_v55 = vpop.f32.mrb[3].mxu0 }
 0x26f   :  { %v1054_v57 = vmul.f32 0.2, %v1236_v52 }
 0x270   :  { %v1055_v59 = vmax.f32 %v1235_v50, %v1053_v54 }
 0x271   :  { %v1056_v60 = vmax.f32 %v1236_v52, %v1054_v57 }
 0x272   :  { %v1078_v61 = vmul.f32 %v1073_v56, %v1055_v59 }
 0x273   :  { %v1079_v38 = vmul.f32 %v1077_v58, %v1056_v60 }
 0x275   :  { %v1080_v41 = vadd.f32 %v1079_v38, %v1078_v61 }
 0x277   :  { %1081 = vadd.xlane.f32.xlu0 %v1080_v41 }
 0x304   :  { %v1082_v63 = vpop.xlane.xlu0 %1081 }
 0x305   :  { %v1090_v0 = vadd.f32 %v1234_v62, %v1082_v63 }
 0x307   :  { %v1091_v1 = vsub.f32 0.0, %v1090_v0 }
 0x309   :  { %v1092_v2 = vmul.f32 1.442695, %v1091_v1 }
 0x30b   :  { %1442 = vpow2.f32 %v1092_v2 }
 0x315   :  { %v1443_v3 = vpop.eup %1442 }
 0x316   :  { %v1094_v4 = vadd.f32 1.0, %v1443_v3 }
 0x318   :  { %1444 = vrcp.f32 %v1094_v4 }
 0x322   :  { %v1445_v5 = vpop.eup %1444 }
 0x323   :  { %1097 = vst.msk [vmem:[%s1658_s7] sm:$0xff] %vm1096_vm0, %v1445_v5 }
 0x324   :  { %1102 = vsyncpa [#allocation4], 1 }
 0x325   :  { %1103 = vsyncpa [#allocation6], 1 }

</bundles_post_ra>
